<compile_context>
chip_gen: v5e
topology: v5e:2x2
jax: 0.10.0
libtpu: 0.0.40
codegen_flags: <defaults>
</compile_context>

<pallas_src>
import jax
import jax.numpy as jnp
from jax.experimental import pallas as pl
from jax.experimental.pallas import tpu as pltpu


# ------------------------------ fused kernel -------------------------------

def make_fused_rnn_kernel(num_layers, seq_len):
    """Builds the fused kernel.  Ref order:
       x_tm(S*B, Din),
       (W_ih_0, W_hh_0, b_0), ..., (W_ih_{L-1}, W_hh_{L-1}, b_{L-1}),
       fc_w, fc_b, out(B, Dout), [seq_buf(S*B, H) scratch if L > 1]
    """

    def kernel(*refs):
        x_ref = refs[0]
        fc_w_ref = refs[1 + 3 * num_layers]
        fc_b_ref = refs[2 + 3 * num_layers]
        o_ref = refs[3 + 3 * num_layers]
        seq_buf = refs[4 + 3 * num_layers] if num_layers > 1 else None

        B = o_ref.shape[0]

        h_last = None
        for layer in range(num_layers):
            w_ih = refs[1 + 3 * layer][...]          # (Din_l, H), hoisted
            w_hh = refs[2 + 3 * layer][...]          # (H, H), hoisted / stationary
            b = refs[3 + 3 * layer][...]             # (1, H), hoisted
            H = w_hh.shape[0]
            is_last = layer == num_layers - 1

            # Batched input projection for ALL time steps in one MXU call,
            # with the (b_ih + b_hh) bias folded in (off the serial chain).
            inp = x_ref[...] if layer == 0 else seq_buf[...]      # (S*B, Din_l)
            pre_all = (
                jnp.dot(inp, w_ih, preferred_element_type=jnp.float32) + b
            )                                                      # (S*B, H)

            # h0 == zeros, exactly as the PyTorch module constructs it.
            h = jnp.zeros((B, H), jnp.float32)
            for t in range(seq_len):                 # fully unrolled time loop
                pre_t = pre_all[t * B:(t + 1) * B, :]              # static slice
                h = jnp.maximum(
                    pre_t + jnp.dot(h, w_hh, preferred_element_type=jnp.float32),
                    0.0,                              # nonlinearity='relu'
                )
                if not is_last:
                    seq_buf[t * B:(t + 1) * B, :] = h  # next layer's matmul LHS
            h_last = h

        # Final Linear on the last time step of the last layer (fused in).
        o_ref[...] = (
            jnp.dot(h_last, fc_w_ref[...], preferred_element_type=jnp.float32)
            + fc_b_ref[...]
        )

    return kernel


# --------------------------------- wrapper ----------------------------------

def model_forward(x, layer_params, fc_w, fc_b):
    """x: (B, S, input_size) -> (B, 1, input_size).  Single fused pallas_call.

    layer_params: list of (W_ih, W_hh, b) with
        W_ih: (Din_l, H)   (pre-transposed so kernels do x @ W)
        W_hh: (H, H)
        b   : (1, H)       (b_ih + b_hh combined)
    """
    B, S, Din = x.shape
    H, Dout = fc_w.shape
    num_layers = len(layer_params)

    # Time-major 2D layout: row t*B + b0  <->  x[b0, t, :].  Host-side layout
    # plumbing so the kernel sees one dense matmul operand.
    x_tm = jnp.transpose(x, (1, 0, 2)).reshape(S * B, Din)

    flat_args = [x_tm]
    for (w_ih, w_hh, b) in layer_params:
        flat_args += [w_ih, w_hh, b]
    flat_args += [fc_w, fc_b]

    vmem = pl.BlockSpec(memory_space=pltpu.MemorySpace.VMEM)
    # 2D (S*B, H) scratch (lane/sublane friendly); only needed for L > 1.
    scratch_shapes = (
        [pltpu.VMEM((S * B, H), jnp.float32)] if num_layers > 1 else []
    )
    # TODO(synk): for large S/B/H, block the batch with a grid over B
    # ("parallel") so the scratch stays within VMEM (notably v7x's 64 MiB).
    out = pl.pallas_call(
        make_fused_rnn_kernel(num_layers, S),
        out_shape=jax.ShapeDtypeStruct((B, Dout), jnp.float32),
        in_specs=[vmem] * len(flat_args),
        out_specs=vmem,
        scratch_shapes=scratch_shapes,
    )(*flat_args)
    return out[:, None, :]          # keep the time dim of size 1 (out[:, -1:, :])


# --------------------------- pure-JAX reference -----------------------------

def ref_forward(x, ref_layer_params, fc_w, fc_b):
    B, S, _ = x.shape
    inp = x
    for (w_ih, w_hh, b) in ref_layer_params:
        H = w_hh.shape[0]
        h = jnp.zeros((B, H), jnp.float32)
        outs = []
        for t in range(S):
            h = jnp.maximum(inp[:, t] @ w_ih + h @ w_hh + b[0], 0.0)
            outs.append(h)
        inp = jnp.stack(outs, axis=1)
    last = inp[:, -1]
    return (last @ fc_w + fc_b[0])[:, None, :]


# --------------------------------- main -------------------------------------

if __name__ == "__main__":
    B, S, INPUT, HIDDEN, LAYERS = 2, 8, 16, 32, 2

    key = jax.random.PRNGKey(0)
    keys = jax.random.split(key, 4 * LAYERS + 3)
    scale = 0.1

    # Shapes match nn.RNN / nn.Linear, stored pre-transposed so kernels do x @ W.
    layer_params = []          # (w_ih, w_hh, b) — used by both kernel and reference
    for l in range(LAYERS):
        din = INPUT if l == 0 else HIDDEN
        k0, k1, k2, k3 = keys[4 * l: 4 * l + 4]
        w_ih = scale * jax.random.normal(k0, (din, HIDDEN), jnp.float32)
        w_hh = scale * jax.random.normal(k1, (HIDDEN, HIDDEN), jnp.float32)
        b_ih = scale * jax.random.normal(k2, (HIDDEN,), jnp.float32)
        b_hh = scale * jax.random.normal(k3, (HIDDEN,), jnp.float32)
        b = (b_ih + b_hh).reshape(1, HIDDEN)
        layer_params.append((w_ih, w_hh, b))

    fc_w = scale * jax.random.normal(keys[-3], (HIDDEN, INPUT), jnp.float32)
    fc_b = scale * jax.random.normal(keys[-2], (INPUT,), jnp.float32).reshape(1, INPUT)

    x = jax.random.normal(keys[-1], (B, S, INPUT), jnp.float32)

    fwd = jax.jit(model_forward)
    out = jax.block_until_ready(fwd(x, layer_params, fc_w, fc_b))

    ref = ref_forward(x, layer_params, fc_w, fc_b)
    assert out.shape == (B, 1, INPUT), out.shape
    assert jnp.allclose(out, ref, atol=1e-4, rtol=1e-4), "mismatch vs reference"

    print("KERNEL_OK")
</pallas_src>

<mosaic_0001>
module attributes {stable_mosaic.version = 11 : i64} {
  func.func @kernel(%arg0: memref<16x16xf32, #tpu.memory_space<vmem>>, %arg1: memref<16x32xf32, #tpu.memory_space<vmem>>, %arg2: memref<32x32xf32, #tpu.memory_space<vmem>>, %arg3: memref<1x32xf32, #tpu.memory_space<vmem>>, %arg4: memref<32x32xf32, #tpu.memory_space<vmem>>, %arg5: memref<32x32xf32, #tpu.memory_space<vmem>>, %arg6: memref<1x32xf32, #tpu.memory_space<vmem>>, %arg7: memref<32x16xf32, #tpu.memory_space<vmem>>, %arg8: memref<1x16xf32, #tpu.memory_space<vmem>>, %arg9: memref<2x16xf32, #tpu.memory_space<vmem>>, %arg10: memref<16x32xf32, #tpu.memory_space<vmem>>) attributes {dimension_semantics = [], scalar_prefetch = 0 : i64, scratch_operands = 1 : i64, tpu.core_type = #tpu.core_type<tc>} {
    %c0 = arith.constant 0 : index
    %c0_0 = arith.constant 0 : index
    %0 = vector.load %arg1[%c0, %c0_0] : memref<16x32xf32, #tpu.memory_space<vmem>>, vector<16x32xf32>
    %c0_1 = arith.constant 0 : index
    %c0_2 = arith.constant 0 : index
    %1 = vector.load %arg2[%c0_1, %c0_2] : memref<32x32xf32, #tpu.memory_space<vmem>>, vector<32x32xf32>
    %c0_3 = arith.constant 0 : index
    %c0_4 = arith.constant 0 : index
    %2 = vector.load %arg3[%c0_3, %c0_4] : memref<1x32xf32, #tpu.memory_space<vmem>>, vector<1x32xf32>
    %c0_5 = arith.constant 0 : index
    %c0_6 = arith.constant 0 : index
    %3 = vector.load %arg0[%c0_5, %c0_6] : memref<16x16xf32, #tpu.memory_space<vmem>>, vector<16x16xf32>
    %cst = arith.constant dense<0.000000e+00> : vector<16x32xf32>
    %4 = tpu.matmul %3, %0, %cst {dimension_numbers = #tpu.dot_dimension_numbers<[1], [0], [0], [1], [0, 0, 1, 1], [], []>} : vector<16x16xf32>, vector<16x32xf32>, vector<16x32xf32> -> vector<16x32xf32>
    %5 = vector.broadcast %2 : vector<1x32xf32> to vector<16x32xf32>
    %6 = arith.addf %4, %5 : vector<16x32xf32>
    %cst_7 = arith.constant 0.000000e+00 : f32
    %7 = vector.broadcast %cst_7 : f32 to vector<2x32xf32>
    %8 = vector.extract_strided_slice %6 {offsets = [0, 0], sizes = [2, 32], strides = [1, 1]} : vector<16x32xf32> to vector<2x32xf32>
    %cst_8 = arith.constant dense<0.000000e+00> : vector<2x32xf32>
    %9 = tpu.matmul %7, %1, %cst_8 {dimension_numbers = #tpu.dot_dimension_numbers<[1], [0], [0], [1], [0, 0, 1, 1], [], []>} : vector<2x32xf32>, vector<32x32xf32>, vector<2x32xf32> -> vector<2x32xf32>
    %10 = arith.addf %8, %9 : vector<2x32xf32>
    %cst_9 = arith.constant 0.000000e+00 : f32
    %11 = vector.broadcast %cst_9 : f32 to vector<2x32xf32>
    %12 = arith.maximumf %10, %11 : vector<2x32xf32>
    %c0_10 = arith.constant 0 : index
    %c0_11 = arith.constant 0 : index
    %13 = vector.load %arg10[%c0_10, %c0_11] : memref<16x32xf32, #tpu.memory_space<vmem>>, vector<2x32xf32>
    tpu.vector_store %arg10[%c0_10, %c0_11], %12 {strides = array<i32>} : memref<16x32xf32, #tpu.memory_space<vmem>>, vector<2x32xf32>,
    %14 = vector.extract_strided_slice %6 {offsets = [2, 0], sizes = [2, 32], strides = [1, 1]} : vector<16x32xf32> to vector<2x32xf32>
    %cst_12 = arith.constant dense<0.000000e+00> : vector<2x32xf32>
    %15 = tpu.matmul %12, %1, %cst_12 {dimension_numbers = #tpu.dot_dimension_numbers<[1], [0], [0], [1], [0, 0, 1, 1], [], []>} : vector<2x32xf32>, vector<32x32xf32>, vector<2x32xf32> -> vector<2x32xf32>
    %16 = arith.addf %14, %15 : vector<2x32xf32>
    %cst_13 = arith.constant 0.000000e+00 : f32
    %17 = vector.broadcast %cst_13 : f32 to vector<2x32xf32>
    %18 = arith.maximumf %16, %17 : vector<2x32xf32>
    %c2 = arith.constant 2 : index
    %c0_14 = arith.constant 0 : index
    %19 = vector.load %arg10[%c2, %c0_14] : memref<16x32xf32, #tpu.memory_space<vmem>>, vector<2x32xf32>
    tpu.vector_store %arg10[%c2, %c0_14], %18 {strides = array<i32>} : memref<16x32xf32, #tpu.memory_space<vmem>>, vector<2x32xf32>,
    %20 = vector.extract_strided_slice %6 {offsets = [4, 0], sizes = [2, 32], strides = [1, 1]} : vector<16x32xf32> to vector<2x32xf32>
    %cst_15 = arith.constant dense<0.000000e+00> : vector<2x32xf32>
    %21 = tpu.matmul %18, %1, %cst_15 {dimension_numbers = #tpu.dot_dimension_numbers<[1], [0], [0], [1], [0, 0, 1, 1], [], []>} : vector<2x32xf32>, vector<32x32xf32>, vector<2x32xf32> -> vector<2x32xf32>
    %22 = arith.addf %20, %21 : vector<2x32xf32>
    %cst_16 = arith.constant 0.000000e+00 : f32
    %23 = vector.broadcast %cst_16 : f32 to vector<2x32xf32>
    %24 = arith.maximumf %22, %23 : vector<2x32xf32>
    %c4 = arith.constant 4 : index
    %c0_17 = arith.constant 0 : index
    %25 = vector.load %arg10[%c4, %c0_17] : memref<16x32xf32, #tpu.memory_space<vmem>>, vector<2x32xf32>
    tpu.vector_store %arg10[%c4, %c0_17], %24 {strides = array<i32>} : memref<16x32xf32, #tpu.memory_space<vmem>>, vector<2x32xf32>,
    %26 = vector.extract_strided_slice %6 {offsets = [6, 0], sizes = [2, 32], strides = [1, 1]} : vector<16x32xf32> to vector<2x32xf32>
    %cst_18 = arith.constant dense<0.000000e+00> : vector<2x32xf32>
    %27 = tpu.matmul %24, %1, %cst_18 {dimension_numbers = #tpu.dot_dimension_numbers<[1], [0], [0], [1], [0, 0, 1, 1], [], []>} : vector<2x32xf32>, vector<32x32xf32>, vector<2x32xf32> -> vector<2x32xf32>
    %28 = arith.addf %26, %27 : vector<2x32xf32>
    %cst_19 = arith.constant 0.000000e+00 : f32
    %29 = vector.broadcast %cst_19 : f32 to vector<2x32xf32>
    %30 = arith.maximumf %28, %29 : vector<2x32xf32>
    %c6 = arith.constant 6 : index
    %c0_20 = arith.constant 0 : index
    %31 = vector.load %arg10[%c6, %c0_20] : memref<16x32xf32, #tpu.memory_space<vmem>>, vector<2x32xf32>
    tpu.vector_store %arg10[%c6, %c0_20], %30 {strides = array<i32>} : memref<16x32xf32, #tpu.memory_space<vmem>>, vector<2x32xf32>,
    %32 = vector.extract_strided_slice %6 {offsets = [8, 0], sizes = [2, 32], strides = [1, 1]} : vector<16x32xf32> to vector<2x32xf32>
    %cst_21 = arith.constant dense<0.000000e+00> : vector<2x32xf32>
    %33 = tpu.matmul %30, %1, %cst_21 {dimension_numbers = #tpu.dot_dimension_numbers<[1], [0], [0], [1], [0, 0, 1, 1], [], []>} : vector<2x32xf32>, vector<32x32xf32>, vector<2x32xf32> -> vector<2x32xf32>
    %34 = arith.addf %32, %33 : vector<2x32xf32>
    %cst_22 = arith.constant 0.000000e+00 : f32
    %35 = vector.broadcast %cst_22 : f32 to vector<2x32xf32>
    %36 = arith.maximumf %34, %35 : vector<2x32xf32>
    %c8 = arith.constant 8 : index
    %c0_23 = arith.constant 0 : index
    %37 = vector.load %arg10[%c8, %c0_23] : memref<16x32xf32, #tpu.memory_space<vmem>>, vector<2x32xf32>
    tpu.vector_store %arg10[%c8, %c0_23], %36 {strides = array<i32>} : memref<16x32xf32, #tpu.memory_space<vmem>>, vector<2x32xf32>,
    %38 = vector.extract_strided_slice %6 {offsets = [10, 0], sizes = [2, 32], strides = [1, 1]} : vector<16x32xf32> to vector<2x32xf32>
    %cst_24 = arith.constant dense<0.000000e+00> : vector<2x32xf32>
    %39 = tpu.matmul %36, %1, %cst_24 {dimension_numbers = #tpu.dot_dimension_numbers<[1], [0], [0], [1], [0, 0, 1, 1], [], []>} : vector<2x32xf32>, vector<32x32xf32>, vector<2x32xf32> -> vector<2x32xf32>
    %40 = arith.addf %38, %39 : vector<2x32xf32>
    %cst_25 = arith.constant 0.000000e+00 : f32
    %41 = vector.broadcast %cst_25 : f32 to vector<2x32xf32>
    %42 = arith.maximumf %40, %41 : vector<2x32xf32>
    %c10 = arith.constant 10 : index
    %c0_26 = arith.constant 0 : index
    %43 = vector.load %arg10[%c10, %c0_26] : memref<16x32xf32, #tpu.memory_space<vmem>>, vector<2x32xf32>
    tpu.vector_store %arg10[%c10, %c0_26], %42 {strides = array<i32>} : memref<16x32xf32, #tpu.memory_space<vmem>>, vector<2x32xf32>,
    %44 = vector.extract_strided_slice %6 {offsets = [12, 0], sizes = [2, 32], strides = [1, 1]} : vector<16x32xf32> to vector<2x32xf32>
    %cst_27 = arith.constant dense<0.000000e+00> : vector<2x32xf32>
    %45 = tpu.matmul %42, %1, %cst_27 {dimension_numbers = #tpu.dot_dimension_numbers<[1], [0], [0], [1], [0, 0, 1, 1], [], []>} : vector<2x32xf32>, vector<32x32xf32>, vector<2x32xf32> -> vector<2x32xf32>
    %46 = arith.addf %44, %45 : vector<2x32xf32>
    %cst_28 = arith.constant 0.000000e+00 : f32
    %47 = vector.broadcast %cst_28 : f32 to vector<2x32xf32>
    %48 = arith.maximumf %46, %47 : vector<2x32xf32>
    %c12 = arith.constant 12 : index
    %c0_29 = arith.constant 0 : index
    %49 = vector.load %arg10[%c12, %c0_29] : memref<16x32xf32, #tpu.memory_space<vmem>>, vector<2x32xf32>
    tpu.vector_store %arg10[%c12, %c0_29], %48 {strides = array<i32>} : memref<16x32xf32, #tpu.memory_space<vmem>>, vector<2x32xf32>,
    %50 = vector.extract_strided_slice %6 {offsets = [14, 0], sizes = [2, 32], strides = [1, 1]} : vector<16x32xf32> to vector<2x32xf32>
    %cst_30 = arith.constant dense<0.000000e+00> : vector<2x32xf32>
    %51 = tpu.matmul %48, %1, %cst_30 {dimension_numbers = #tpu.dot_dimension_numbers<[1], [0], [0], [1], [0, 0, 1, 1], [], []>} : vector<2x32xf32>, vector<32x32xf32>, vector<2x32xf32> -> vector<2x32xf32>
    %52 = arith.addf %50, %51 : vector<2x32xf32>
    %cst_31 = arith.constant 0.000000e+00 : f32
    %53 = vector.broadcast %cst_31 : f32 to vector<2x32xf32>
    %54 = arith.maximumf %52, %53 : vector<2x32xf32>
    %c14 = arith.constant 14 : index
    %c0_32 = arith.constant 0 : index
    %55 = vector.load %arg10[%c14, %c0_32] : memref<16x32xf32, #tpu.memory_space<vmem>>, vector<2x32xf32>
    tpu.vector_store %arg10[%c14, %c0_32], %54 {strides = array<i32>} : memref<16x32xf32, #tpu.memory_space<vmem>>, vector<2x32xf32>,
    %c0_33 = arith.constant 0 : index
    %c0_34 = arith.constant 0 : index
    %56 = vector.load %arg4[%c0_33, %c0_34] : memref<32x32xf32, #tpu.memory_space<vmem>>, vector<32x32xf32>
    %c0_35 = arith.constant 0 : index
    %c0_36 = arith.constant 0 : index
    %57 = vector.load %arg5[%c0_35, %c0_36] : memref<32x32xf32, #tpu.memory_space<vmem>>, vector<32x32xf32>
    %c0_37 = arith.constant 0 : index
    %c0_38 = arith.constant 0 : index
    %58 = vector.load %arg6[%c0_37, %c0_38] : memref<1x32xf32, #tpu.memory_space<vmem>>, vector<1x32xf32>
    %c0_39 = arith.constant 0 : index
    %c0_40 = arith.constant 0 : index
    %59 = vector.load %arg10[%c0_39, %c0_40] : memref<16x32xf32, #tpu.memory_space<vmem>>, vector<16x32xf32>
    %cst_41 = arith.constant dense<0.000000e+00> : vector<16x32xf32>
    %60 = tpu.matmul %59, %56, %cst_41 {dimension_numbers = #tpu.dot_dimension_numbers<[1], [0], [0], [1], [0, 0, 1, 1], [], []>} : vector<16x32xf32>, vector<32x32xf32>, vector<16x32xf32> -> vector<16x32xf32>
    %61 = vector.broadcast %58 : vector<1x32xf32> to vector<16x32xf32>
    %62 = arith.addf %60, %61 : vector<16x32xf32>
    %cst_42 = arith.constant 0.000000e+00 : f32
    %63 = vector.broadcast %cst_42 : f32 to vector<2x32xf32>
    %64 = vector.extract_strided_slice %62 {offsets = [0, 0], sizes = [2, 32], strides = [1, 1]} : vector<16x32xf32> to vector<2x32xf32>
    %cst_43 = arith.constant dense<0.000000e+00> : vector<2x32xf32>
    %65 = tpu.matmul %63, %57, %cst_43 {dimension_numbers = #tpu.dot_dimension_numbers<[1], [0], [0], [1], [0, 0, 1, 1], [], []>} : vector<2x32xf32>, vector<32x32xf32>, vector<2x32xf32> -> vector<2x32xf32>
    %66 = arith.addf %64, %65 : vector<2x32xf32>
    %cst_44 = arith.constant 0.000000e+00 : f32
    %67 = vector.broadcast %cst_44 : f32 to vector<2x32xf32>
    %68 = arith.maximumf %66, %67 : vector<2x32xf32>
    %69 = vector.extract_strided_slice %62 {offsets = [2, 0], sizes = [2, 32], strides = [1, 1]} : vector<16x32xf32> to vector<2x32xf32>
    %cst_45 = arith.constant dense<0.000000e+00> : vector<2x32xf32>
    %70 = tpu.matmul %68, %57, %cst_45 {dimension_numbers = #tpu.dot_dimension_numbers<[1], [0], [0], [1], [0, 0, 1, 1], [], []>} : vector<2x32xf32>, vector<32x32xf32>, vector<2x32xf32> -> vector<2x32xf32>
    %71 = arith.addf %69, %70 : vector<2x32xf32>
    %cst_46 = arith.constant 0.000000e+00 : f32
    %72 = vector.broadcast %cst_46 : f32 to vector<2x32xf32>
    %73 = arith.maximumf %71, %72 : vector<2x32xf32>
    %74 = vector.extract_strided_slice %62 {offsets = [4, 0], sizes = [2, 32], strides = [1, 1]} : vector<16x32xf32> to vector<2x32xf32>
    %cst_47 = arith.constant dense<0.000000e+00> : vector<2x32xf32>
    %75 = tpu.matmul %73, %57, %cst_47 {dimension_numbers = #tpu.dot_dimension_numbers<[1], [0], [0], [1], [0, 0, 1, 1], [], []>} : vector<2x32xf32>, vector<32x32xf32>, vector<2x32xf32> -> vector<2x32xf32>
    %76 = arith.addf %74, %75 : vector<2x32xf32>
    %cst_48 = arith.constant 0.000000e+00 : f32
    %77 = vector.broadcast %cst_48 : f32 to vector<2x32xf32>
    %78 = arith.maximumf %76, %77 : vector<2x32xf32>
    %79 = vector.extract_strided_slice %62 {offsets = [6, 0], sizes = [2, 32], strides = [1, 1]} : vector<16x32xf32> to vector<2x32xf32>
    %cst_49 = arith.constant dense<0.000000e+00> : vector<2x32xf32>
    %80 = tpu.matmul %78, %57, %cst_49 {dimension_numbers = #tpu.dot_dimension_numbers<[1], [0], [0], [1], [0, 0, 1, 1], [], []>} : vector<2x32xf32>, vector<32x32xf32>, vector<2x32xf32> -> vector<2x32xf32>
    %81 = arith.addf %79, %80 : vector<2x32xf32>
    %cst_50 = arith.constant 0.000000e+00 : f32
    %82 = vector.broadcast %cst_50 : f32 to vector<2x32xf32>
    %83 = arith.maximumf %81, %82 : vector<2x32xf32>
    %84 = vector.extract_strided_slice %62 {offsets = [8, 0], sizes = [2, 32], strides = [1, 1]} : vector<16x32xf32> to vector<2x32xf32>
    %cst_51 = arith.constant dense<0.000000e+00> : vector<2x32xf32>
    %85 = tpu.matmul %83, %57, %cst_51 {dimension_numbers = #tpu.dot_dimension_numbers<[1], [0], [0], [1], [0, 0, 1, 1], [], []>} : vector<2x32xf32>, vector<32x32xf32>, vector<2x32xf32> -> vector<2x32xf32>
    %86 = arith.addf %84, %85 : vector<2x32xf32>
    %cst_52 = arith.constant 0.000000e+00 : f32
    %87 = vector.broadcast %cst_52 : f32 to vector<2x32xf32>
    %88 = arith.maximumf %86, %87 : vector<2x32xf32>
    %89 = vector.extract_strided_slice %62 {offsets = [10, 0], sizes = [2, 32], strides = [1, 1]} : vector<16x32xf32> to vector<2x32xf32>
    %cst_53 = arith.constant dense<0.000000e+00> : vector<2x32xf32>
    %90 = tpu.matmul %88, %57, %cst_53 {dimension_numbers = #tpu.dot_dimension_numbers<[1], [0], [0], [1], [0, 0, 1, 1], [], []>} : vector<2x32xf32>, vector<32x32xf32>, vector<2x32xf32> -> vector<2x32xf32>
    %91 = arith.addf %89, %90 : vector<2x32xf32>
    %cst_54 = arith.constant 0.000000e+00 : f32
    %92 = vector.broadcast %cst_54 : f32 to vector<2x32xf32>
    %93 = arith.maximumf %91, %92 : vector<2x32xf32>
    %94 = vector.extract_strided_slice %62 {offsets = [12, 0], sizes = [2, 32], strides = [1, 1]} : vector<16x32xf32> to vector<2x32xf32>
    %cst_55 = arith.constant dense<0.000000e+00> : vector<2x32xf32>
    %95 = tpu.matmul %93, %57, %cst_55 {dimension_numbers = #tpu.dot_dimension_numbers<[1], [0], [0], [1], [0, 0, 1, 1], [], []>} : vector<2x32xf32>, vector<32x32xf32>, vector<2x32xf32> -> vector<2x32xf32>
    %96 = arith.addf %94, %95 : vector<2x32xf32>
    %cst_56 = arith.constant 0.000000e+00 : f32
    %97 = vector.broadcast %cst_56 : f32 to vector<2x32xf32>
    %98 = arith.maximumf %96, %97 : vector<2x32xf32>
    %99 = vector.extract_strided_slice %62 {offsets = [14, 0], sizes = [2, 32], strides = [1, 1]} : vector<16x32xf32> to vector<2x32xf32>
    %cst_57 = arith.constant dense<0.000000e+00> : vector<2x32xf32>
    %100 = tpu.matmul %98, %57, %cst_57 {dimension_numbers = #tpu.dot_dimension_numbers<[1], [0], [0], [1], [0, 0, 1, 1], [], []>} : vector<2x32xf32>, vector<32x32xf32>, vector<2x32xf32> -> vector<2x32xf32>
    %101 = arith.addf %99, %100 : vector<2x32xf32>
    %cst_58 = arith.constant 0.000000e+00 : f32
    %102 = vector.broadcast %cst_58 : f32 to vector<2x32xf32>
    %103 = arith.maximumf %101, %102 : vector<2x32xf32>
    %c0_59 = arith.constant 0 : index
    %c0_60 = arith.constant 0 : index
    %104 = vector.load %arg7[%c0_59, %c0_60] : memref<32x16xf32, #tpu.memory_space<vmem>>, vector<32x16xf32>
    %cst_61 = arith.constant dense<0.000000e+00> : vector<2x16xf32>
    %105 = tpu.matmul %103, %104, %cst_61 {dimension_numbers = #tpu.dot_dimension_numbers<[1], [0], [0], [1], [0, 0, 1, 1], [], []>} : vector<2x32xf32>, vector<32x16xf32>, vector<2x16xf32> -> vector<2x16xf32>
    %c0_62 = arith.constant 0 : index
    %c0_63 = arith.constant 0 : index
    %106 = vector.load %arg8[%c0_62, %c0_63] : memref<1x16xf32, #tpu.memory_space<vmem>>, vector<1x16xf32>
    %107 = vector.broadcast %106 : vector<1x16xf32> to vector<2x16xf32>
    %108 = arith.addf %105, %107 : vector<2x16xf32>
    %c0_64 = arith.constant 0 : index
    %c0_65 = arith.constant 0 : index
    %109 = vector.load %arg9[%c0_64, %c0_65] : memref<2x16xf32, #tpu.memory_space<vmem>>, vector<2x16xf32>
    tpu.vector_store %arg9[%c0_64, %c0_65], %108 {strides = array<i32>} : memref<2x16xf32, #tpu.memory_space<vmem>>, vector<2x16xf32>,
    return
  }
}

</mosaic_0001>

<bundles_post_ra>
// kernel: model_forward.1
= control target key start
LH: loop header
LB: loop body
LE: loop exit
PB: predicated region body
PF: predicated region fallthrough
CT: control target
= control target key end

     0   :  { %14 = vsyncpa [#allocation4], 0  ;;  %s923_s0 = inlined_call_operand.vmem [shape: f32[16,16], index: 0, kind: input, shape index: {}]   ;;  %s924_s1 = inlined_call_operand.hbm [shape: f32[16,32], index: 1, kind: input, shape index: {}]   ;;  %s925_s2 = inlined_call_operand.vmem [shape: f32[32,32], index: 2, kind: input, shape index: {}]   ;;  %s926_s3 = inlined_call_operand.vmem [shape: f32[1,32], index: 3, kind: input, shape index: {}]   ;;  %s927_s4 = inlined_call_operand.vmem [shape: f32[32,32], index: 4, kind: input, shape index: {}]   ;;  %s928_s5 = inlined_call_operand.hbm [shape: f32[32,32], index: 5, kind: input, shape index: {}]   ;;  %s929_s6 = inlined_call_operand.vmem [shape: f32[1,32], index: 6, kind: input, shape index: {}]   ;;  %s930_s7 = inlined_call_operand.vmem [shape: f32[32,16], index: 7, kind: input, shape index: {}]   ;;  %s931_s8 = inlined_call_operand.vmem [shape: f32[1,16], index: 8, kind: input, shape index: {}]   ;;  %s932_s9 = inlined_call_operand.hbm [shape: f32[2,16], index: 9, kind: output, shape index: {}]  }
   0x1   :  { %15 = vsyncpa [#allocation7], 0 }
   0x2   :  { %16 = vsyncpa [#allocation5], 0  ;;  %s23_s11 = sshll.u32 %s924_s1, 4  ;;  %s764_s12 = smov [#allocation3]   ;;  %s24_s11 = int_to_ptr.hbm [resolvable:$true] %s23_s11 }
   0x3   :  { %s25_s13 = sshll.u32 %s764_s12, 4  ;;  %s42_s16 = sshll.u32 %s928_s5, 4  ;;  %s26_s13 = int_to_ptr.vmem [resolvable:$true] %s25_s13  ;;  %s43_s16 = int_to_ptr.hbm [resolvable:$true] %s42_s16 }
   0x4   :  { %s765_s17 = smov 128   ;;  %s766_s18 = smov 8  }
   0x5   :  { %31 = dma.hbm_to_vmem [thread:$0]  %s24_s11, 256, %s26_s13, [#allocation4], %s765_s17, %s765_s17, %s766_s18  }
   0x6   :  { %s767_s19 = smov [#allocation6]  }
   0x7   :  { %s44_s20 = sshll.u32 %s767_s19, 4  ;;  %s45_s20 = int_to_ptr.vmem [resolvable:$true] %s44_s20 }
   0x8   :  { %50 = dma.hbm_to_vmem [thread:$0]  %s43_s16, 512, %s45_s20, [#allocation7], %s765_s17, %s765_s17, %s766_s18  }
   0x9   :  { %758 = dma.done.wait [#allocation4], 256  }
   0xa   :  { %759 = vsyncadd [#allocation4], 4294967040 }
   0xb   :  { %760 = dma.done.wait [#allocation7], 512  }
   0xc   :  { %761 = vsyncadd [#allocation7], 4294966784  ;;  %v70_v0 = vld [vmem:[%s925_s2 + $0x18] sm:$0xff]  ;;  %v69_v2 = vld [vmem:[%s925_s2 + $0x10] sm:$0xff]  ;;  %vm77_vm0 = vcmask 130048   ;;  %v768_v7 = vmov 0.0  }
   0xd   :  { %v66_v1 = vld [vmem:[#allocation3 + $0x8] sm:$0xff]  ;;  %123 = vmatpush.msra.mxu1 %v70_v0  ;;  %v65_v3 = vld [vmem:[#allocation3] sm:$0xff]  ;;  %v72_v4 = vld [vmem:[%s923_s0] sm:$0xff]  ;;  %150 = vmatpush.msra.mxu2 %v70_v0  ;;  %vm133_vm1 = vcmask 254976   ;;  %vm107_vm2 = vcmask 261120   ;;  %vm163_vm3 = vcmask 257026  }
   0xe   :  { %98 = vmatpush.msra.mxu0 %v66_v1  ;;  %v68_v5 = vld [vmem:[%s925_s2 + $0x8] sm:$0xff]  ;;  %181 = vmatpush.msra.mxu3 %v70_v0  ;;  %v67_v6 = vld [vmem:[%s925_s2] sm:$0xff]  ;;  %vm194_vm4 = vcmask 259076   ;;  %v346_v24 = vld [vmem:[%s927_s4 + $0x18] sm:$0xff]  ;;  %vm225_vm5 = vcmask 261126   ;;  %s769_s25 = smov [#allocation8]  }
   0xf   :  { %124 = vmatpush.msra.mxu1 %v69_v2  ;;  %151 = vmatpush.msra.mxu2 %v69_v2  ;;  %v846_v8 = vld [vmem:[%s926_s3] ss:$0 sm:$0xff]  ;;  %v345_v25 = vld [vmem:[%s927_s4 + $0x10] sm:$0xff]  ;;  %v73_v26 = vld [vmem:[%s923_s0 + $0x8] sm:$0xff]  ;;  %s645_s26 = sshll.u32 %s769_s25, 4  ;;  %s647_s2 = sshll.u32 %s932_s9, 4  ;;  %s646_s26 = int_to_ptr.vmem [resolvable:$true] %s645_s26  ;;  %s648_s2 = int_to_ptr.hbm [resolvable:$true] %s647_s2 }
  0x10   :  { %99 = vmatpush.msra.mxu0 %v65_v3  ;;  %182 = vmatpush.msra.mxu3 %v69_v2  ;;  %v344_v27 = vld [vmem:[%s927_s4 + $0x8] sm:$0xff]  ;;  %v343_v28 = vld [vmem:[%s927_s4] sm:$0xff]  ;;  %v874_v35 = vld [vmem:[#allocation6 + $0x18] sm:$0xff]  ;;  %vm638_vm6 = vcmask 123904  }
  0x11   :  { %658 = vmatmul.msk.f32.vlgmr.msra.gmra.mxu0 %vm77_vm0, %v72_v4  ;;  %125 = vmatpush.msra.mxu1 %v68_v5  ;;  %v349_v36 = vld [vmem:[#allocation6 + $0x10] sm:$0xff]  ;;  %v348_v37 = vld [vmem:[#allocation6 + $0x8] sm:$0xff]  ;;  %v347_v38 = vld [vmem:[#allocation6] sm:$0xff] }
  0x12   :  { %152 = vmatpush.msra.mxu2 %v68_v5  ;;  %299 = vmatpush.msrb.mxu0 %v70_v0  ;;  %v684_v47 = vld [vmem:[%s929_s6] ss:$0 sm:$0xff] }
  0x13   :  { %126 = vmatpush.msra.mxu1 %v67_v6  ;;  %183 = vmatpush.msra.mxu3 %v68_v5 }
  0x14   :  { %127 = vmatmul.f32.vlgmr.msra.gmra.mxu1 %v768_v7  ;;  %153 = vmatpush.msra.mxu2 %v67_v6 }
  0x15   :  { %184 = vmatpush.msra.mxu3 %v67_v6  ;;  %212 = vmatpush.msrb.mxu1 %v70_v0 }
  0x16   :  { %243 = vmatpush.msrb.mxu2 %v70_v0  ;;  %300 = vmatpush.msrb.mxu0 %v69_v2 }
  0x17   :  { %269 = vmatpush.msrb.mxu3 %v70_v0  ;;  %213 = vmatpush.msrb.mxu1 %v69_v2 }
  0x18   :  { %244 = vmatpush.msrb.mxu2 %v69_v2  ;;  %301 = vmatpush.msrb.mxu0 %v68_v5 }
  0x19   :  { %270 = vmatpush.msrb.mxu3 %v69_v2  ;;  %214 = vmatpush.msrb.mxu1 %v68_v5 }
  0x1a   :  { %245 = vmatpush.msrb.mxu2 %v68_v5  ;;  %302 = vmatpush.msrb.mxu0 %v67_v6 }
  0x1b   :  { %271 = vmatpush.msrb.mxu3 %v68_v5  ;;  %215 = vmatpush.msrb.mxu1 %v67_v6 }
  0x1c   :  { %246 = vmatpush.msrb.mxu2 %v67_v6  ;;  %659 = vmatmul.msk.f32.gmra.mxu0 %vm77_vm0, %v73_v26 }
  0x1d   :  { %272 = vmatpush.msrb.mxu3 %v67_v6  ;;  %329 = vmatpush.msra.mxu1 %v70_v0 }
  0x1e   :  { %423 = vmatpush.msra.mxu0 %v874_v35 }
  0x1f   :  { %330 = vmatpush.msra.mxu1 %v69_v2 }
  0x20   :  { %424 = vmatpush.msra.mxu0 %v349_v36 }
  0x21   :  { %331 = vmatpush.msra.mxu1 %v68_v5 }
  0x22   :  { %425 = vmatpush.msra.mxu0 %v348_v37 }
  0x23   :  { %332 = vmatpush.msra.mxu1 %v67_v6 }
  0x24   :  { %426 = vmatpush.msra.mxu0 %v347_v38 }
  0x8e   :  { %v101_v9 = vpop.f32.mrf.mxu0 }
  0x8f   :  { %v102_v10 = vadd.f32 %v846_v8, %v101_v9 }
  0x91   :  { %v128_v11 = vpop.f32.mrf.mxu1 }
  0x92   :  { %v131_v12 = vadd.f32 %v128_v11, %v102_v10 }
  0x94   :  { %v132_v13 = vmax.f32 %v131_v12, 0.0 }
  0x96   :  { %134 = vst.msk [vmem:[#allocation2] sm:$0x3] %vm133_vm1, %v132_v13  ;;  %660 = vmatmul.msk.f32.vlgmr.msra.gmra.mxu2 %vm107_vm2, %v132_v13 }
  0x97   :  { %375 = vmatpush.msra.mxu2 %v346_v24 }
  0x99   :  { %376 = vmatpush.msra.mxu2 %v345_v25  ;;  %v104_v39 = vpop.f32.mrf.mxu0 }
  0x9a   :  { %v105_v40 = vadd.f32 %v846_v8, %v104_v39 }
  0x9b   :  { %377 = vmatpush.msra.mxu2 %v344_v27 }
  0x9d   :  { %378 = vmatpush.msra.mxu2 %v343_v28 }
 0x119   :  { %v155_v14 = vpop.f32.mrf.mxu2 }
 0x11a   :  { %v159_v15 = vrot.slane %v155_v14, 6 }
 0x11c   :  { %v161_v16 = vadd.f32 %v159_v15, %v102_v10 }
 0x11e   :  { %v162_v17 = vmax.f32 %v161_v16, 0.0 }
 0x120   :  { %164 = vst.msk [vmem:[#allocation2] sm:$0xc] %vm163_vm3, %v162_v17  ;;  %v166_v18 = vrot.slane %v162_v17, 2 }
 0x122   :  { %661 = vmatmul.msk.f32.vlgmr.msra.gmra.mxu3 %vm107_vm2, %v166_v18 }
 0x123   :  { %398 = vmatpush.msra.mxu3 %v874_v35 }
 0x125   :  { %399 = vmatpush.msra.mxu3 %v349_v36 }
 0x127   :  { %400 = vmatpush.msra.mxu3 %v348_v37 }
 0x129   :  { %401 = vmatpush.msra.mxu3 %v347_v38 }
 0x1a5   :  { %v186_v19 = vpop.f32.mrf.mxu3 }
 0x1a6   :  { %v190_v20 = vrot.slane %v186_v19, 4 }
 0x1a8   :  { %v192_v21 = vadd.f32 %v190_v20, %v102_v10 }
 0x1aa   :  { %v193_v22 = vmax.f32 %v192_v21, 0.0 }
 0x1ac   :  { %195 = vst.msk [vmem:[#allocation2] sm:$0x30] %vm194_vm4, %v193_v22  ;;  %v197_v23 = vrot.slane %v193_v22, 4 }
 0x1ae   :  { %662 = vmatmul.msk.f32.vlgmr.msrb.gmra.mxu1 %vm107_vm2, %v197_v23 }
 0x1af   :  { %452 = vmatpush.msrb.mxu1 %v874_v35 }
 0x1b1   :  { %453 = vmatpush.msrb.mxu1 %v349_v36 }
 0x1b3   :  { %454 = vmatpush.msrb.mxu1 %v348_v37 }
 0x1b5   :  { %455 = vmatpush.msrb.mxu1 %v347_v38 }
 0x22b   :  { %v217_v29 = vpop.f32.mrf.mxu1 }
 0x22c   :  { %v221_v30 = vrot.slane %v217_v29, 2 }
 0x22e   :  { %v223_v31 = vadd.f32 %v221_v30, %v102_v10 }
 0x230   :  { %v224_v32 = vmax.f32 %v223_v31, 0.0  ;;  %v609_v31 = vld [vmem:[%s930_s7 + $0x18] sm:$0xff] }
 0x232   :  { %226 = vst.msk [vmem:[#allocation2] sm:$0xc0] %vm225_vm5, %v224_v32  ;;  %v228_v33 = vrot.slane %v224_v32, 6  ;;  %v608_v32 = vld [vmem:[%s930_s7 + $0x10] sm:$0xff] }
 0x234   :  { %663 = vmatmul.msk.f32.vlgmr.msrb.gmra.mxu2 %vm107_vm2, %v228_v33  ;;  %v607_v33 = vld [vmem:[%s930_s7 + $0x8] sm:$0xff] }
 0x235   :  { %564 = vmatpush.msrb.mxu2 %v874_v35 }
 0x237   :  { %565 = vmatpush.msrb.mxu2 %v349_v36 }
 0x239   :  { %v352_v34 = vld [vmem:[#allocation2] sm:$0xff]  ;;  %566 = vmatpush.msrb.mxu2 %v348_v37 }
 0x23b   :  { %567 = vmatpush.msrb.mxu2 %v347_v38 }
 0x23c   :  { %667 = vmatmul.msk.f32.vlgmr.msra.gmra.mxu2 %vm107_vm2, %v352_v34  ;;  %v606_v34 = vld [vmem:[%s930_s7] sm:$0xff] }
 0x2b7   :  { %v248_v41 = vpop.f32.mrf.mxu2 }
 0x2b8   :  { %v251_v42 = vadd.f32 %v248_v41, %v105_v40 }
 0x2ba   :  { %v252_v43 = vmax.f32 %v251_v42, 0.0 }
 0x2bc   :  { %253 = vst.msk [vmem:[#allocation2 + $0x8] sm:$0x3] %vm133_vm1, %v252_v43  ;;  %664 = vmatmul.msk.f32.vlgmr.msrb.gmra.mxu3 %vm107_vm2, %v252_v43 }
 0x2bd   :  { %481 = vmatpush.msrb.mxu3 %v874_v35 }
 0x2bf   :  { %482 = vmatpush.msrb.mxu3 %v349_v36  ;;  %v380_v49 = vpop.f32.mrf.mxu2 }
 0x2c0   :  { %v381_v52 = vadd.f32 %v684_v47, %v380_v49 }
 0x2c1   :  { %483 = vmatpush.msrb.mxu3 %v348_v37 }
 0x2c3   :  { %484 = vmatpush.msrb.mxu3 %v347_v38 }
 0x2c4   :  { %402 = vmatmul.f32.vlgmr.msra.gmra.mxu3 %v768_v7 }
 0x2c5   :  { %593 = vmatpush.msra.mxu3 %v874_v35 }
 0x2c7   :  { %594 = vmatpush.msra.mxu3 %v349_v36 }
 0x2c9   :  { %595 = vmatpush.msra.mxu3 %v348_v37 }
 0x2cb   :  { %596 = vmatpush.msra.mxu3 %v347_v38 }
 0x33f   :  { %v274_v44 = vpop.f32.mrf.mxu3 }
 0x340   :  { %v278_v45 = vrot.slane %v274_v44, 6 }
 0x342   :  { %v280_v46 = vadd.f32 %v278_v45, %v105_v40 }
 0x344   :  { %v281_v48 = vmax.f32 %v280_v46, 0.0 }
 0x346   :  { %282 = vst.msk [vmem:[#allocation2 + $0x8] sm:$0xc] %vm163_vm3, %v281_v48  ;;  %v284_v50 = vrot.slane %v281_v48, 2 }
 0x347   :  { %v403_v51 = vpop.f32.mrf.mxu3 }
 0x348   :  { %665 = vmatmul.msk.f32.vlgmr.msrb.gmra.mxu0 %vm107_vm2, %v284_v50  ;;  %v406_v53 = vadd.f32 %v403_v51, %v381_v52 }
 0x349   :  { %510 = vmatpush.msrb.mxu0 %v874_v35 }
 0x34a   :  { %v407_v54 = vmax.f32 %v406_v53, 0.0 }
 0x34b   :  { %511 = vmatpush.msrb.mxu0 %v349_v36 }
 0x34d   :  { %512 = vmatpush.msrb.mxu0 %v348_v37 }
 0x34f   :  { %513 = vmatpush.msrb.mxu0 %v347_v38 }
 0x350   :  { %669 = vmatmul.msk.f32.vlgmr.msra.gmra.mxu0 %vm107_vm2, %v407_v54 }
 0x351   :  { %630 = vmatpush.msra.mxu0 %v609_v31 }
 0x353   :  { %631 = vmatpush.msra.mxu0 %v608_v32 }
 0x355   :  { %632 = vmatpush.msra.mxu0 %v607_v33 }
 0x357   :  { %633 = vmatpush.msra.mxu0 %v606_v34 }
 0x3c5   :  { %v304_v55 = vpop.f32.mrf.mxu0 }
 0x3c6   :  { %v308_v56 = vrot.slane %v304_v55, 4 }
 0x3c8   :  { %v310_v57 = vadd.f32 %v308_v56, %v105_v40 }
 0x3ca   :  { %v311_v58 = vmax.f32 %v310_v57, 0.0 }
 0x3cc   :  { %312 = vst.msk [vmem:[#allocation2 + $0x8] sm:$0x30] %vm194_vm4, %v311_v58  ;;  %v314_v59 = vrot.slane %v311_v58, 4 }
 0x3cd   :  { %v428_v60 = vpop.f32.mrf.mxu0 }
 0x3ce   :  { %v432_v61 = vrot.slane %v428_v60, 6  ;;  %666 = vmatmul.msk.f32.vlgmr.msra.gmra.mxu1 %vm107_vm2, %v314_v59 }
 0x3cf   :  { %535 = vmatpush.msra.mxu1 %v874_v35 }
 0x3d0   :  { %v434_v62 = vadd.f32 %v432_v61, %v381_v52 }
 0x3d1   :  { %536 = vmatpush.msra.mxu1 %v349_v36 }
 0x3d2   :  { %v435_v63 = vmax.f32 %v434_v62, 0.0 }
 0x3d3   :  { %537 = vmatpush.msra.mxu1 %v348_v37 }
 0x3d4   :  { %v437_v0 = vrot.slane %v435_v63, 2 }
 0x3d5   :  { %538 = vmatpush.msra.mxu1 %v347_v38 }
 0x3d6   :  { %670 = vmatmul.msk.f32.vlgmr.msrb.gmra.mxu1 %vm107_vm2, %v437_v0 }
 0x44b   :  { %v334_v1 = vpop.f32.mrf.mxu1 }
 0x44c   :  { %v338_v2 = vrot.slane %v334_v1, 2 }
 0x44e   :  { %v340_v3 = vadd.f32 %v338_v2, %v105_v40  ;;  %v685_v40 = vld [vmem:[%s931_s8] ss:$0 sm:$0xff] }
 0x450   :  { %v341_v4 = vmax.f32 %v340_v3, 0.0 }
 0x452   :  { %342 = vst.msk [vmem:[#allocation2 + $0x8] sm:$0xc0] %vm225_vm5, %v341_v4 }
 0x453   :  { %v457_v5 = vpop.f32.mrf.mxu1 }
 0x454   :  { %v461_v6 = vrot.slane %v457_v5, 4 }
 0x456   :  { %v463_v7 = vadd.f32 %v461_v6, %v381_v52 }
 0x458   :  { %v464_v8 = vmax.f32 %v463_v7, 0.0 }
 0x459   :  { %v353_v9 = vld [vmem:[#allocation2 + $0x8] sm:$0xff] }
 0x45a   :  { %v466_v10 = vrot.slane %v464_v8, 4  ;;  %668 = vmatmul.msk.f32.gmra.mxu2 %vm107_vm2, %v353_v9 }
 0x45c   :  { %671 = vmatmul.msk.f32.vlgmr.msrb.gmra.mxu3 %vm107_vm2, %v466_v10 }
 0x4dd   :  { %v383_v16 = vpop.f32.mrf.mxu2 }
 0x4de   :  { %v384_v17 = vadd.f32 %v684_v47, %v383_v16 }
 0x4df   :  { %v486_v11 = vpop.f32.mrf.mxu3 }
 0x4e0   :  { %v490_v12 = vrot.slane %v486_v11, 2 }
 0x4e2   :  { %v492_v13 = vadd.f32 %v490_v12, %v381_v52 }
 0x4e4   :  { %v493_v14 = vmax.f32 %v492_v13, 0.0 }
 0x4e6   :  { %v495_v15 = vrot.slane %v493_v14, 6 }
 0x4e8   :  { %672 = vmatmul.msk.f32.vlgmr.msrb.gmra.mxu0 %vm107_vm2, %v495_v15 }
 0x565   :  { %v515_v18 = vpop.f32.mrf.mxu0 }
 0x566   :  { %v518_v19 = vadd.f32 %v515_v18, %v384_v17 }
 0x568   :  { %v519_v20 = vmax.f32 %v518_v19, 0.0 }
 0x56a   :  { %673 = vmatmul.msk.f32.vlgmr.msra.gmra.mxu1 %vm107_vm2, %v519_v20 }
 0x5e7   :  { %v540_v21 = vpop.f32.mrf.mxu1 }
 0x5e8   :  { %v544_v22 = vrot.slane %v540_v21, 6 }
 0x5ea   :  { %v546_v23 = vadd.f32 %v544_v22, %v384_v17 }
 0x5ec   :  { %v547_v24 = vmax.f32 %v546_v23, 0.0 }
 0x5ee   :  { %v549_v25 = vrot.slane %v547_v24, 2 }
 0x5f0   :  { %674 = vmatmul.msk.f32.vlgmr.msrb.gmra.mxu2 %vm107_vm2, %v549_v25 }
 0x673   :  { %v569_v26 = vpop.f32.mrf.mxu2 }
 0x674   :  { %v573_v27 = vrot.slane %v569_v26, 4 }
 0x676   :  { %v575_v28 = vadd.f32 %v573_v27, %v384_v17 }
 0x678   :  { %v576_v29 = vmax.f32 %v575_v28, 0.0 }
 0x67a   :  { %v578_v30 = vrot.slane %v576_v29, 4 }
 0x67c   :  { %675 = vmatmul.msk.f32.vlgmr.msra.gmra.mxu3 %vm107_vm2, %v578_v30 }
 0x6ff   :  { %v598_v35 = vpop.f32.mrf.mxu3 }
 0x700   :  { %v602_v36 = vrot.slane %v598_v35, 2 }
 0x702   :  { %v604_v37 = vadd.f32 %v602_v36, %v384_v17 }
 0x704   :  { %v605_v38 = vmax.f32 %v604_v37, 0.0 }
 0x706   :  { %v615_v39 = vrot.slane %v605_v38, 6 }
 0x708   :  { %676 = vmatmul.msk.f32.vlgmr.msra.gmra.mxu0 %vm107_vm2, %v615_v39 }
 0x785   :  { %v635_v41 = vpop.f32.mrf.mxu0 }
 0x786   :  { %v636_v42 = vadd.f32 %v685_v40, %v635_v41 }
 0x788   :  { %639 = vst.msk [vmem:[#allocation8] sm:$0x3] %vm638_vm6, %v636_v42 }
 0x789   :  { %650 = dma.vmem_to_hbm [thread:$0]  %s646_s26, 32, %s648_s2, [#allocation5]  }
 0x78a   :  { %762 = dma.done.wait [#allocation5], 32  }
 0x78b   :  { %763 = vsyncadd [#allocation5], 4294967264 }
 0x78c   :  { %655 = vsyncpa [#allocation4], 1 }
 0x78d   :  { %656 = vsyncpa [#allocation7], 1 }
 0x78e   :  { %657 = vsyncpa [#allocation5], 1 }

</bundles_post_ra>
